<compile_context>
chip_gen: v5e
topology: v5e:2x2
jax: 0.10.0
libtpu: 0.0.40
codegen_flags: <defaults>
</compile_context>

<pallas_src>
import math

import jax
import jax.numpy as jnp
from jax.experimental import pallas as pl
from jax.experimental.pallas import tpu as pltpu


def _neuron_comp_kernel(x_ref, w1_ref, w2_ref, b_ref, o_ref):
    # x_ref : (tb, inst*feats)               activations for one batch tile
    # w1_ref: (inst*feats, inst*d_hidden)    block-diagonal W1^T (resident)
    # w2_ref: (inst*d_hidden, inst*feats)    block-diagonal W2^T (resident)
    # b_ref : (1, inst*feats)                bias (resident)
    x = x_ref[...]
    h = jnp.maximum(
        jnp.dot(x, w1_ref[...], preferred_element_type=jnp.float32), 0.0
    )
    out = jnp.dot(h, w2_ref[...], preferred_element_type=jnp.float32) + b_ref[...]
    o_ref[...] = jnp.maximum(out, 0.0).astype(o_ref.dtype)


def neuron_computation_forward(features, W1, W2, b_final, *, block_batch=512):
    """features: [batch, inst, feats], W1: [inst, d_hidden, feats],
    W2: [inst, feats, d_hidden], b_final: [inst, feats] -> [batch, inst, feats]."""
    batch, n_inst, n_feats = features.shape
    d_hidden = W1.shape[1]
    IF = n_inst * n_feats
    IH = n_inst * d_hidden

    # ---- one-time HBM-side weight plumbing (tiny, static per forward) ------
    # Block-diagonal W1^T: rows index (inst, feat), cols index (inst, hidden)
    #   W1bd[i*F + f, j*H + d] = (i == j) * W1[i, d, f]
    # Block-diagonal W2^T: rows index (inst, hidden), cols index (inst, feat)
    #   W2bd[i*H + d, j*F + f] = (i == j) * W2[i, f, d]
    eye = jnp.eye(n_inst, dtype=W1.dtype)
    W1T = jnp.transpose(W1, (0, 2, 1))                       # (I, F, H)
    W2T = jnp.transpose(W2, (0, 2, 1))                       # (I, H, F)
    W1bd = (eye[:, None, :, None] * W1T[:, :, None, :]).reshape(IF, IH)
    W2bd = (eye[:, None, :, None] * W2T[:, :, None, :]).reshape(IH, IF)
    b_row = b_final.reshape(1, IF)

    # ---- activations: lane-dense (batch, inst*feats), no transpose ---------
    x2d = features.reshape(batch, IF)

    # Batch tile: multiple of 8 sublanes; pad batch so the grid divides evenly.
    tb = max(8, min(block_batch, batch))
    tb = ((tb + 7) // 8) * 8
    n_blocks = pl.cdiv(batch, tb)
    padded_batch = n_blocks * tb
    if padded_batch != batch:
        x2d = jnp.pad(x2d, ((0, padded_batch - batch), (0, 0)))

    out2d = pl.pallas_call(
        _neuron_comp_kernel,
        out_shape=jax.ShapeDtypeStruct((padded_batch, IF), features.dtype),
        grid=(n_blocks,),
        in_specs=[
            pl.BlockSpec((tb, IF), lambda i: (i, 0)),        # x: streams over batch
            pl.BlockSpec((IF, IH), lambda i: (0, 0)),        # W1bd: resident
            pl.BlockSpec((IH, IF), lambda i: (0, 0)),        # W2bd: resident
            pl.BlockSpec((1, IF), lambda i: (0, 0)),         # bias: resident
        ],
        out_specs=pl.BlockSpec((tb, IF), lambda i: (i, 0)),
        compiler_params=pltpu.CompilerParams(
            dimension_semantics=("parallel",),
        ),
    )(x2d, W1bd, W2bd, b_row)

    return out2d[:batch].reshape(batch, n_inst, n_feats)


def kaiming_uniform(key, shape):
    """Deterministic stand-in for nn.init.kaiming_uniform_ (fan_in, a=sqrt(5) ignored; a=0)."""
    fan_in = shape[1] * shape[2]
    bound = math.sqrt(6.0 / fan_in)
    return jax.random.uniform(key, shape, jnp.float32, minval=-bound, maxval=bound)


if __name__ == "__main__":
    # ToyModelConfig defaults: n_features=5, d_hidden=2; small n_inst/batch.
    n_inst, n_features, d_hidden, batch = 4, 5, 2, 200

    key = jax.random.PRNGKey(0)
    k_x, k_w1, k_w2 = jax.random.split(key, 3)

    features = jax.random.uniform(
        k_x, (batch, n_inst, n_features), jnp.float32, minval=-1.0, maxval=1.0
    )
    W1 = kaiming_uniform(k_w1, (n_inst, d_hidden, n_features))
    W2 = kaiming_uniform(k_w2, (n_inst, n_features, d_hidden))
    b_final = jnp.zeros((n_inst, n_features), jnp.float32)

    # block_batch=64 -> grid of 4 batch tiles (also exercises batch padding).
    out = neuron_computation_forward(features, W1, W2, b_final, block_batch=64)
    out = jax.block_until_ready(out)

    # Pure-JAX reference.
    h_ref = jax.nn.relu(
        jnp.einsum("bif,ihf->bih", features, W1, precision="highest")
    )
    out_ref = jax.nn.relu(
        jnp.einsum("bih,ifh->bif", h_ref, W2, precision="highest") + b_final[None]
    )
    assert out.shape == (batch, n_inst, n_features)
    assert jnp.allclose(out, out_ref, atol=1e-4, rtol=1e-4)

    print("KERNEL_OK")
</pallas_src>

<mosaic_0001>
module attributes {stable_mosaic.version = 11 : i64} {
  func.func @_neuron_comp_kernel(%arg0: i32, %arg1: memref<64x20xf32, #tpu.memory_space<vmem>>, %arg2: memref<20x8xf32, #tpu.memory_space<vmem>>, %arg3: memref<8x20xf32, #tpu.memory_space<vmem>>, %arg4: memref<1x20xf32, #tpu.memory_space<vmem>>, %arg5: memref<64x20xf32, #tpu.memory_space<vmem>>) attributes {dimension_semantics = [#tpu.dimension_semantics<parallel>], iteration_bounds = array<i64: 4>, scalar_prefetch = 0 : i64, scratch_operands = 0 : i64, tpu.core_type = #tpu.core_type<tc>, window_params = [{transform_indices = @transform_0, window_bounds = array<i64: 64, 20>}, {pipeline_mode = #tpu.pipeline_mode<synchronous>, transform_indices = @transform_1, window_bounds = array<i64: 20, 8>}, {pipeline_mode = #tpu.pipeline_mode<synchronous>, transform_indices = @transform_2, window_bounds = array<i64: 8, 20>}, {pipeline_mode = #tpu.pipeline_mode<synchronous>, transform_indices = @transform_3, window_bounds = array<i64: 1, 20>}, {transform_indices = @transform_4, window_bounds = array<i64: 64, 20>}]} {
    %c0 = arith.constant 0 : index
    %c0_0 = arith.constant 0 : index
    %0 = vector.load %arg1[%c0, %c0_0] : memref<64x20xf32, #tpu.memory_space<vmem>>, vector<64x20xf32>
    %c0_1 = arith.constant 0 : index
    %c0_2 = arith.constant 0 : index
    %1 = vector.load %arg2[%c0_1, %c0_2] : memref<20x8xf32, #tpu.memory_space<vmem>>, vector<20x8xf32>
    %cst = arith.constant dense<0.000000e+00> : vector<64x8xf32>
    %2 = tpu.matmul %0, %1, %cst {dimension_numbers = #tpu.dot_dimension_numbers<[1], [0], [0], [1], [0, 0, 1, 1], [], []>} : vector<64x20xf32>, vector<20x8xf32>, vector<64x8xf32> -> vector<64x8xf32>
    %cst_3 = arith.constant 0.000000e+00 : f32
    %3 = vector.broadcast %cst_3 : f32 to vector<64x8xf32>
    %4 = arith.maximumf %2, %3 : vector<64x8xf32>
    %c0_4 = arith.constant 0 : index
    %c0_5 = arith.constant 0 : index
    %5 = vector.load %arg3[%c0_4, %c0_5] : memref<8x20xf32, #tpu.memory_space<vmem>>, vector<8x20xf32>
    %cst_6 = arith.constant dense<0.000000e+00> : vector<64x20xf32>
    %6 = tpu.matmul %4, %5, %cst_6 {dimension_numbers = #tpu.dot_dimension_numbers<[1], [0], [0], [1], [0, 0, 1, 1], [], []>} : vector<64x8xf32>, vector<8x20xf32>, vector<64x20xf32> -> vector<64x20xf32>
    %c0_7 = arith.constant 0 : index
    %c0_8 = arith.constant 0 : index
    %7 = vector.load %arg4[%c0_7, %c0_8] : memref<1x20xf32, #tpu.memory_space<vmem>>, vector<1x20xf32>
    %8 = vector.broadcast %7 : vector<1x20xf32> to vector<64x20xf32>
    %9 = arith.addf %6, %8 : vector<64x20xf32>
    %cst_9 = arith.constant 0.000000e+00 : f32
    %10 = vector.broadcast %cst_9 : f32 to vector<64x20xf32>
    %11 = arith.maximumf %9, %10 : vector<64x20xf32>
    %c0_10 = arith.constant 0 : index
    %c0_11 = arith.constant 0 : index
    %12 = vector.load %arg5[%c0_10, %c0_11] : memref<64x20xf32, #tpu.memory_space<vmem>>, vector<64x20xf32>
    tpu.vector_store %arg5[%c0_10, %c0_11], %11 {strides = array<i32>} : memref<64x20xf32, #tpu.memory_space<vmem>>, vector<64x20xf32>,
    return
  }
  func.func @transform_0(%arg0: i32) -> (i32, i32) {
    %c0_i32 = arith.constant 0 : i32
    %c0_i32_0 = arith.constant 0 : i32
    return %arg0, %c0_i32 : i32, i32
  }
  func.func @transform_1(%arg0: i32) -> (i32, i32) {
    %c0_i32 = arith.constant 0 : i32
    %c0_i32_0 = arith.constant 0 : i32
    %c0_i32_1 = arith.constant 0 : i32
    return %c0_i32, %c0_i32_0 : i32, i32
  }
  func.func @transform_2(%arg0: i32) -> (i32, i32) {
    %c0_i32 = arith.constant 0 : i32
    %c0_i32_0 = arith.constant 0 : i32
    %c0_i32_1 = arith.constant 0 : i32
    return %c0_i32, %c0_i32_0 : i32, i32
  }
  func.func @transform_3(%arg0: i32) -> (i32, i32) {
    %c0_i32 = arith.constant 0 : i32
    %c0_i32_0 = arith.constant 0 : i32
    %c0_i32_1 = arith.constant 0 : i32
    return %c0_i32, %c0_i32_0 : i32, i32
  }
  func.func @transform_4(%arg0: i32) -> (i32, i32) {
    %c0_i32 = arith.constant 0 : i32
    %c0_i32_0 = arith.constant 0 : i32
    return %arg0, %c0_i32 : i32, i32
  }
}

</mosaic_0001>

<bundles_post_ra>
// kernel: tpu_custom_call.1
= control target key start
LH: loop header
LB: loop body
LE: loop exit
PB: predicated region body
PF: predicated region fallthrough
CT: control target
= control target key end

     0   :  { %s507_s15 = smov 0   ;;  %s570_s0 = inlined_call_operand.vmem [shape: f32[256,20], index: 0, kind: input, shape index: {}]   ;;  %s571_s1 = inlined_call_operand.vmem [shape: f32[20,8], index: 1, kind: input, shape index: {}]   ;;  %s572_s2 = inlined_call_operand.vmem [shape: f32[8,20], index: 2, kind: input, shape index: {}]   ;;  %s573_s3 = inlined_call_operand.vmem [shape: f32[1,20], index: 3, kind: input, shape index: {}]   ;;  %s574_s4 = inlined_call_operand.vmem [shape: f32[256,20], index: 4, kind: output, shape index: {}]  }
   0x1 LB: > { %s433_s16 = sadd.s32 4294967295, %s480_s15   ;;  %p437_p0 = scmp.ge.s32.totalorder %s480_s15, 1  ;;  %s480_s15 = sphi %s507_s15, %s14_s15  }
   0x2   : > { %p163_p1 = scmp.lt.s32.totalorder %s480_s15, 5 }
   0x4   : > { %p164_p2 = pnand %p437_p0, %p163_p1 }
   0x5   : > { %s438_s21 = sshll.u32 (!%p164_p2), %s433_s16, 3 }
   0x6   : > { %167 = sbr.rel (%p164_p2) target bundleno = 312 (0x138), region = 36  ;;  %p190_p3 = scmp.lt.s32.totalorder (!%p164_p2), %s438_s21, 31 }
   0xb   : > { %v211_v0 = vld [vmem:[%s571_s1 + $0x10] sm:$0xf]  ;;  %vm237_vm0 = vcmask 1043456   ;;  %v210_v1 = vld [vmem:[%s571_s1 + $0x8] sm:$0xff]  ;;  %v209_v2 = vld [vmem:[%s571_s1] sm:$0xff]  ;;  %s576_s21 = smov (!%p190_p3, %s438_s21), 31 }
   0xc   : > { %442 = vmatpush.msk.msra.mxu0 %vm237_vm0, %v211_v0  ;;  %461 = vmatpush.msk.msra.mxu2 %vm237_vm0, %v211_v0  ;;  %s439_s24 = sshll.u32 %s576_s21, 3  ;;  %vm212_vm1 = vcmask 162816   ;;  %v290_v11 = vld [vmem:[%s572_s2] sm:$0xff]  ;;  %vm295_vm2 = vcmask 64512  }
   0xd   : > { %s193_s27 = scalar_lea.vmem %s570_s0, %s439_s24  ;;  %335 = vmatpush.msra.mxu1 %v290_v11  ;;  %464 = vmatpush.msra.mxu3 %v290_v11  ;;  %v473_v28 = vld [vmem:[%s573_s3] ss:$0 sm:$0xff]  ;;  %s199_s8 = scalar_lea.vmem %s574_s4, %s439_s24 }
   0xe   : > { %255 = vmatpush.msra.mxu0 %v210_v1  ;;  %462 = vmatpush.msra.mxu2 %v210_v1  ;;  %v201_v3 = vld [vmem:[%s193_s27] sm:$0xff]  ;;  %v202_v5 = vld [vmem:[%s193_s27 + $0x8] sm:$0xff]  ;;  %v203_v7 = vld [vmem:[%s193_s27 + $0x10] sm:$0xff] }
   0xf   : > { %v205_v4 = vld [vmem:[%s193_s27 + $0x20] sm:$0xff]  ;;  %v206_v6 = vld [vmem:[%s193_s27 + $0x28] sm:$0xff]  ;;  %v207_v8 = vld [vmem:[%s193_s27 + $0x30] sm:$0xff] }
  0x10   : > { %256 = vmatpush.msra.mxu0 %v209_v2  ;;  %463 = vmatpush.msra.mxu2 %v209_v2  ;;  %v204_v9 = vld [vmem:[%s193_s27 + $0x18] sm:$0xff] }
  0x11   : > { %443 = vmatmul.msk.f32.vlgmr.msra.gmra.mxu0 %vm212_vm1, %v201_v3  ;;  %447 = vmatmul.msk.f32.vlgmr.msra.gmra.mxu2 %vm212_vm1, %v205_v4  ;;  %v208_v10 = vld [vmem:[%s193_s27 + $0x38] sm:$0xff] }
  0x19   : > { %444 = vmatmul.msk.f32.gmra.mxu0 %vm212_vm1, %v202_v5  ;;  %448 = vmatmul.msk.f32.gmra.mxu2 %vm212_vm1, %v206_v6 }
  0x21   : > { %445 = vmatmul.msk.f32.gmra.mxu0 %vm212_vm1, %v203_v7  ;;  %449 = vmatmul.msk.f32.gmra.mxu2 %vm212_vm1, %v207_v8 }
  0x29   : > { %446 = vmatmul.msk.f32.gmra.mxu0 %vm212_vm1, %v204_v9  ;;  %450 = vmatmul.msk.f32.gmra.mxu2 %vm212_vm1, %v208_v10 }
  0x8e   : > { %v258_v12 = vpop.f32.mrf.mxu0 }
  0x8f   : > { %v282_v13 = vmax.f32 %v258_v12, 0.0 }
  0x91   : > { %451 = vmatmul.msk.f32.vlgmr.msra.gmra.mxu1 %vm295_vm2, %v282_v13 }
  0x94   : > { %v270_v14 = vpop.f32.mrf.mxu2 }
  0x95   : > { %v286_v27 = vmax.f32 %v270_v14, 0.0 }
  0x96   : > { %v261_v15 = vpop.f32.mrf.mxu0 }
  0x97   : > { %v283_v16 = vmax.f32 %v261_v15, 0.0 }
  0x99   : > { %452 = vmatmul.msk.f32.gmra.mxu1 %vm295_vm2, %v283_v16 }
  0x9c   : > { %v273_v17 = vpop.f32.mrf.mxu2 }
  0x9d   : > { %v287_v18 = vmax.f32 %v273_v17, 0.0 }
  0x9e   : > { %v264_v19 = vpop.f32.mrf.mxu0 }
  0x9f   : > { %v284_v20 = vmax.f32 %v264_v19, 0.0  ;;  %456 = vmatmul.msk.f32.vlgmr.msra.gmra.mxu3 %vm295_vm2, %v287_v18 }
  0xa1   : > { %453 = vmatmul.msk.f32.gmra.mxu1 %vm295_vm2, %v284_v20 }
  0xa4   : > { %v276_v21 = vpop.f32.mrf.mxu2 }
  0xa5   : > { %v288_v22 = vmax.f32 %v276_v21, 0.0 }
  0xa6   : > { %v267_v23 = vpop.f32.mrf.mxu0 }
  0xa7   : > { %v285_v24 = vmax.f32 %v267_v23, 0.0  ;;  %457 = vmatmul.msk.f32.gmra.mxu3 %vm295_vm2, %v288_v22 }
  0xa9   : > { %454 = vmatmul.msk.f32.gmra.mxu1 %vm295_vm2, %v285_v24 }
  0xac   : > { %v279_v25 = vpop.f32.mrf.mxu2 }
  0xad   : > { %v289_v26 = vmax.f32 %v279_v25, 0.0 }
  0xaf   : > { %458 = vmatmul.msk.f32.gmra.mxu3 %vm295_vm2, %v289_v26 }
  0xb1   : > { %455 = vmatmul.msk.f32.gmra.mxu1 %vm295_vm2, %v286_v27 }
 0x10e   : > { %v337_v29 = vpop.f32.mrf.mxu1 }
 0x10f   : > { %v338_v30 = vadd.f32 %v473_v28, %v337_v29 }
 0x111   : > { %v361_v31 = vmax.f32 %v338_v30, 0.0 }
 0x113   : > { %369 = vst.msk [vmem:[%s199_s8] sm:$0xff] %vm212_vm1, %v361_v31 }
 0x116   : > { %v340_v32 = vpop.f32.mrf.mxu1 }
 0x117   : > { %v341_v33 = vadd.f32 %v473_v28, %v340_v32 }
 0x119   : > { %v362_v34 = vmax.f32 %v341_v33, 0.0 }
 0x11b   : > { %370 = vst.msk [vmem:[%s199_s8 + $0x8] sm:$0xff] %vm212_vm1, %v362_v34 }
 0x11e   : > { %v343_v35 = vpop.f32.mrf.mxu1 }
 0x11f   : > { %v344_v36 = vadd.f32 %v473_v28, %v343_v35 }
 0x121   : > { %v363_v37 = vmax.f32 %v344_v36, 0.0 }
 0x122   : > { %v352_v38 = vpop.f32.mrf.mxu3 }
 0x123   : > { %371 = vst.msk [vmem:[%s199_s8 + $0x10] sm:$0xff] %vm212_vm1, %v363_v37  ;;  %v353_v39 = vadd.f32 %v473_v28, %v352_v38 }
 0x125   : > { %v366_v40 = vmax.f32 %v353_v39, 0.0 }
 0x126   : > { %v346_v41 = vpop.f32.mrf.mxu1 }
 0x127   : > { %374 = vst.msk [vmem:[%s199_s8 + $0x28] sm:$0xff] %vm212_vm1, %v366_v40  ;;  %v347_v42 = vadd.f32 %v473_v28, %v346_v41 }
 0x129   : > { %v364_v43 = vmax.f32 %v347_v42, 0.0 }
 0x12a   : > { %v355_v44 = vpop.f32.mrf.mxu3 }
 0x12b   : > { %372 = vst.msk [vmem:[%s199_s8 + $0x18] sm:$0xff] %vm212_vm1, %v364_v43  ;;  %v356_v45 = vadd.f32 %v473_v28, %v355_v44 }
 0x12d   : > { %v367_v46 = vmax.f32 %v356_v45, 0.0 }
 0x12e   : > { %v349_v47 = vpop.f32.mrf.mxu1 }
 0x12f   : > { %375 = vst.msk [vmem:[%s199_s8 + $0x30] sm:$0xff] %vm212_vm1, %v367_v46  ;;  %v350_v48 = vadd.f32 %v473_v28, %v349_v47 }
 0x131   : > { %v365_v49 = vmax.f32 %v350_v48, 0.0 }
 0x132   : > { %v358_v50 = vpop.f32.mrf.mxu3 }
 0x133   : > { %373 = vst.msk [vmem:[%s199_s8 + $0x20] sm:$0xff] %vm212_vm1, %v365_v49  ;;  %v359_v51 = vadd.f32 %v473_v28, %v358_v50 }
 0x135   : > { %v368_v52 = vmax.f32 %v359_v51, 0.0 }
 0x137   : > { %376 = vst.msk [vmem:[%s199_s8 + $0x38] sm:$0xff] %vm212_vm1, %v368_v52 }
 0x138 PF: > { %s14_s15 = sadd.s32 1, %s480_s15  }
 0x139   : > { %p11_p4 = scmp.ge.s32.totalorder %s14_s15, 6  }
 0x13b   :  { %13 = sbr.rel (!%p11_p4) target bundleno = 1 (0x1), region = 66 }

</bundles_post_ra>
